<compile_context>
chip_gen: v6e
topology: v6e:2x2x1
jax: 0.10.0
libtpu: 0.0.40
codegen_flags: <defaults>
</compile_context>

<pallas_src>
import functools

import jax
import jax.numpy as jnp
from jax.experimental import pallas as pl
from jax.experimental.pallas import tpu as pltpu


def _round_up(x: int, m: int) -> int:
    return (x + m - 1) // m * m


def logreg_kernel(bias_ref, x_ref, w_ref, o_ref):
    """One batch tile of logistic regression.

    bias_ref: (1,)       f32 SMEM  -- bias (scalar prefetch)
    x_ref:    (TB, F)    f32 VMEM  -- input tile (auto-pipelined)
    w_ref:    (1, F)     f32 VMEM  -- weight row (resident across the grid)
    o_ref:    (1, 1, TB) f32 VMEM  -- lane-dense output row for this tile
    """
    x = x_ref[...]          # (TB, F)
    w = w_ref[...]          # (1, F)
    # (1, F) . (TB, F) contracting over F -> (1, TB): logits row, lane-dense.
    logits = jax.lax.dot_general(
        w, x,
        dimension_numbers=(((1,), (1,)), ((), ())),
        preferred_element_type=jnp.float32,
    )
    logits = logits + bias_ref[0]
    o_ref[...] = jax.nn.sigmoid(logits)[None].astype(o_ref.dtype)


@functools.partial(jax.jit, static_argnames=("block_rows",))
def logistic_regression(x, w, b, *, block_rows=512):
    """sigmoid(x @ w.T + b) — same semantics as torch.nn.Linear(F, 1) + sigmoid.

    x: (B, F) float32
    w: (1, F) float32   (torch `linear.weight` layout)
    b: (1,)   float32   (torch `linear.bias` layout)
    returns: (B, 1) float32
    """
    batch, feat = x.shape
    assert w.shape == (1, feat) and b.shape == (1,)

    # Batch tile: multiple of 128 (lane-dense output rows), capped by block_rows.
    # block_rows=512 keeps the double-buffered x tile comfortably inside the scoped
    # VMEM budget on v5e/v6e/v7x for moderate F; shrink block_rows for very large F.
    block_rows = _round_up(max(block_rows, 128), 128)
    tb = min(block_rows, _round_up(batch, 128))
    batch_padded = _round_up(batch, tb)
    if batch_padded != batch:
        x = jnp.pad(x, ((0, batch_padded - batch), (0, 0)))
    num_tiles = batch_padded // tb

    out = pl.pallas_call(
        logreg_kernel,
        out_shape=jax.ShapeDtypeStruct((num_tiles, 1, tb), jnp.float32),
        grid_spec=pltpu.PrefetchScalarGridSpec(
            num_scalar_prefetch=1,                                   # bias -> SMEM
            grid=(num_tiles,),
            in_specs=[
                pl.BlockSpec((tb, feat), lambda i, bias: (i, 0)),    # x batch tile
                pl.BlockSpec((1, feat), lambda i, bias: (0, 0)),     # w (resident)
            ],
            out_specs=pl.BlockSpec((1, 1, tb), lambda i, bias: (i, 0, 0)),
        ),
        compiler_params=pltpu.CompilerParams(
            dimension_semantics=("parallel",),        # v7x: split batch tiles over TCs
            vmem_limit_bytes=32 * 1024 * 1024,
        ),
    )(b, x, w)

    # (num_tiles, 1, TB) -> (B, 1), dropping any batch padding.
    return out.reshape(-1)[:batch].reshape(batch, 1)


if __name__ == "__main__":
    key = jax.random.PRNGKey(0)
    kx, kw, kb = jax.random.split(key, 3)

    batch = 200               # not a multiple of the tile -> exercises padding path
    n_input_features = 32

    # PyTorch nn.Linear default init: uniform in [-1/sqrt(F), 1/sqrt(F)].
    bound = 1.0 / float(n_input_features) ** 0.5

    # Round test inputs to bf16-representable f32 values so the correctness check is
    # insensitive to which f32 matmul precision mode the MXU / XLA reference uses.
    def _q(v):
        return v.astype(jnp.bfloat16).astype(jnp.float32)

    w = _q(jax.random.uniform(kw, (1, n_input_features), jnp.float32, -bound, bound))
    b = _q(jax.random.uniform(kb, (1,), jnp.float32, -bound, bound))
    x = _q(jax.random.normal(kx, (batch, n_input_features), jnp.float32))

    out = logistic_regression(x, w, b, block_rows=128)   # 128-row tiles -> 2 grid steps
    out = jax.block_until_ready(out)

    # Reference check in plain JAX (matches torch: x @ W.T + b, then sigmoid).
    ref = jax.nn.sigmoid(x @ w.T + b)
    assert out.shape == (batch, 1)
    assert jnp.allclose(out, ref, atol=1e-5), "mismatch vs reference"

    print("KERNEL_OK")
</pallas_src>

<mosaic_0001>
module attributes {stable_mosaic.version = 11 : i64} {
  func.func @logreg_kernel(%arg0: i32, %arg1: memref<1xf32, #tpu.memory_space<smem>>, %arg2: memref<128x32xf32, #tpu.memory_space<vmem>>, %arg3: memref<1x32xf32, #tpu.memory_space<vmem>>, %arg4: memref<1x1x128xf32, #tpu.memory_space<vmem>>) attributes {dimension_semantics = [#tpu.dimension_semantics<parallel>], iteration_bounds = array<i64: 2>, scalar_prefetch = 1 : i64, scratch_operands = 0 : i64, tpu.core_type = #tpu.core_type<tc>, window_params = [{transform_indices = @transform_0, window_bounds = array<i64: 128, 32>}, {pipeline_mode = #tpu.pipeline_mode<synchronous>, transform_indices = @transform_1, window_bounds = array<i64: 1, 32>}, {transform_indices = @transform_2, window_bounds = array<i64: 1, 1, 128>}]} {
    %c0 = arith.constant 0 : index
    %c0_0 = arith.constant 0 : index
    %0 = vector.load %arg2[%c0, %c0_0] : memref<128x32xf32, #tpu.memory_space<vmem>>, vector<128x32xf32>
    %c0_1 = arith.constant 0 : index
    %c0_2 = arith.constant 0 : index
    %1 = vector.load %arg3[%c0_1, %c0_2] : memref<1x32xf32, #tpu.memory_space<vmem>>, vector<1x32xf32>
    %cst = arith.constant dense<0.000000e+00> : vector<1x128xf32>
    %2 = tpu.matmul %1, %0, %cst {dimension_numbers = #tpu.dot_dimension_numbers<[1], [1], [0], [0], [0, 0, 1, 0], [], []>} : vector<1x32xf32>, vector<128x32xf32>, vector<1x128xf32> -> vector<1x128xf32>
    %c0_3 = arith.constant 0 : index
    %3 = memref.load %arg1[%c0_3] : memref<1xf32, #tpu.memory_space<smem>>
    %4 = vector.broadcast %3 : f32 to vector<1x128xf32>
    %5 = arith.addf %2, %4 : vector<1x128xf32>
    %6 = arith.negf %5 : vector<1x128xf32>
    %7 = math.exp %6 : vector<1x128xf32>
    %cst_4 = arith.constant 1.000000e+00 : f32
    %8 = vector.broadcast %cst_4 : f32 to vector<1x128xf32>
    %9 = arith.addf %8, %7 : vector<1x128xf32>
    %10 = arith.divf %8, %9 : vector<1x128xf32>
    %11 = vector.shape_cast %10 : vector<1x128xf32> to vector<1x1x128xf32>
    %c0_5 = arith.constant 0 : index
    %c0_6 = arith.constant 0 : index
    %c0_7 = arith.constant 0 : index
    %12 = vector.load %arg4[%c0_5, %c0_6, %c0_7] : memref<1x1x128xf32, #tpu.memory_space<vmem>>, vector<1x1x128xf32>
    tpu.vector_store %arg4[%c0_5, %c0_6, %c0_7], %11 {strides = array<i32>} : memref<1x1x128xf32, #tpu.memory_space<vmem>>, vector<1x1x128xf32>,
    return
  }
  func.func @transform_0(%arg0: i32, %arg1: memref<1xf32, #tpu.memory_space<smem>>) -> (i32, i32) {
    %c0_i32 = arith.constant 0 : i32
    %c0_i32_0 = arith.constant 0 : i32
    return %arg0, %c0_i32 : i32, i32
  }
  func.func @transform_1(%arg0: i32, %arg1: memref<1xf32, #tpu.memory_space<smem>>) -> (i32, i32) {
    %c0_i32 = arith.constant 0 : i32
    %c0_i32_0 = arith.constant 0 : i32
    %c0_i32_1 = arith.constant 0 : i32
    return %c0_i32, %c0_i32_0 : i32, i32
  }
  func.func @transform_2(%arg0: i32, %arg1: memref<1xf32, #tpu.memory_space<smem>>) -> (i32, i32, i32) {
    %c0_i32 = arith.constant 0 : i32
    %c0_i32_0 = arith.constant 0 : i32
    %c0_i32_1 = arith.constant 0 : i32
    return %arg0, %c0_i32, %c0_i32_0 : i32, i32, i32
  }
}

</mosaic_0001>

<bundles_post_ra>
// kernel: logistic_regression.1
= control target key start
LH: loop header
LB: loop body
LE: loop exit
PB: predicated region body
PF: predicated region fallthrough
CT: control target
= control target key end

     0   :  { %s703_s0 = inlined_call_operand.<no memory space> [shape: f32[1], index: 0, kind: input, shape index: {}]   ;;  %s704_s1 = inlined_call_operand.vmem [shape: f32[256,32], index: 1, kind: input, shape index: {}]   ;;  %s705_s2 = inlined_call_operand.vmem [shape: f32[1,32], index: 2, kind: input, shape index: {}]   ;;  %s706_s3 = inlined_call_operand.hbm [shape: f32[2,1,128], index: 3, kind: output, shape index: {}]  }
   0x1   :  { %8 = sst [smem:[#allocation3]] %s703_s0 }
   0x2   :  { %9 = vsyncpa [#allocation5], 0 }
   0x3   :  { %11 = vsyncpa [#allocation5 + $0x1], 0  ;;  %s573_s14 = smov 0   ;;  %s575_s15 = smov 0  }
   0x4   :  { %s577_s16 = smov 0   ;;  %s579_s17 = smov 0  }
   0x5 LB: > { %s360_s0 = sadd.s32 4294967295, %s545_s17   ;;  %s361_s18 = sadd.s32 4294967294, %s545_s17   ;;  %s545_s17 = sphi %s579_s17, %s712_s17   ;;  %s541_s16 = sphi %s577_s16, %s711_s16   ;;  %s537_s15 = sphi %s575_s15, %s710_s15   ;;  %s533_s14 = sphi %s573_s14, %s709_s14  }
   0x6   : > { %s596_s19 = sadd.s32 1, %s545_s17   ;;  %s71_s20 = sadd.s32 1, %s541_s16 }
   0x7   : > { %s68_s21 = ssub.s32 %s545_s17, %s596_s19  ;;  %p81_p0 = scmp.ne.s32.totalorder %s541_s16, %s537_s15 }
   0x8   : > { %p69_p1 = scmp.eq.s32.totalorder %s68_s21, 0  ;;  %p82_p2 = scmp.eq.s32.totalorder %s360_s0, 1 }
   0x9   : > { %p87_p3 = scmp.ne.s32.totalorder %s537_s15, %s533_s14  ;;  %p88_p4 = scmp.eq.s32.totalorder %s361_s18, 1 }
   0xa   : > { %s606_s22 = scalar_select %p69_p1, %s541_s16, %s71_s20  }
   0xb   : > { %p608_p5 = por %p82_p2, %p81_p0  ;;  %p612_p6 = por %p88_p4, %p87_p3 }
   0xc   : > { %p364_p7 = scmp.ge.s32.totalorder %s545_s17, 1  ;;  %p118_p8 = scmp.lt.s32.totalorder %s545_s17, 3 }
   0xe   : > { %p119_p9 = pnand %p364_p7, %p118_p8 }
   0xf   : > { %s618_s25 = sshll.u32 (!%p119_p9), %s360_s0, 4  ;;  %s162_s6 = sld [smem:[#allocation3]] (!%p119_p9) }
  0x10   : > { %122 = sbr.rel (%p119_p9) target bundleno = 329 (0x149), region = 28  ;;  %p140_p10 = scmp.lt.s32.totalorder (!%p119_p9), %s618_s25, 31 }
  0x11   : > { %s137_s7 = sand.u32 (!%p119_p9), 1, %s537_s15   ;;  %s668_s12 = scalar_lea.hbm (!%p119_p9), %s706_s3, %s618_s25 }
  0x12   : > { %s138_s8 = scalar_lea.vmem (!%p119_p9), [#allocation4], %s137_s7  ;;  %s294_s13 = scalar_lea.sflag (!%p119_p9), [#allocation5], %s137_s7 }
  0x13   : > { %s306_s9 = sshll.u32 (!%p119_p9), %s138_s8, 4  ;;  %s549_s18 = smov (!%p119_p9), [#allocation4]   ;;  %s307_s9 = int_to_ptr.vmem [resolvable:$true] %s306_s9 }
  0x14   : > { %s485_s0 = scalar_lea.vmem (!%p119_p9), %s307_s9, 16  ;;  %s489_s20 = sshll.u32 (!%p119_p9), %s549_s18, 4  ;;  %s490_s20 = int_to_ptr.vmem [resolvable:$false] %s489_s20 }
  0x15   : > { %v547_v0 = vmov 0.0   ;;  %vm548_vm0 = vmmov 0   ;;  %s141_s26 = scalar_select %p140_p10, %s618_s25, 31  ;;  %vm164_vm1 = vcmask 261120   ;;  %v161_v17 = vld [vmem:[%s705_s2] sm:$0x1]  ;;  %v163_v18 = vstv %s162_s6 }
  0x16   : > { %405 = vmatprep.subr.mxu0 %v547_v0  ;;  %437 = vmatprep.mubr.msk.f32.mxu0 %vm548_vm0, %v547_v0  ;;  %p486_p11 = scmp.ne.s32.totalorder %s307_s9, %s485_s0  ;;  %s491_s21 = scalar_lea.vmem %s490_s20, 32 }
  0x17   : > { %s366_s27 = sshll.u32 %s141_s26, 3  ;;  %p492_p0 = scmp.lt.s32.totalorder %s307_s9, %s490_s20 }
  0x18   : > { %s625_s30 = scalar_lea.vmem %s704_s1, %s366_s27  ;;  %p487_p12 = pnand %p486_p11, %p608_p5 }
  0x19   : > { %v160_v1 = vld [vmem:[%s625_s30 + $0x78] sm:$0xff]  ;;  %v159_v2 = vld [vmem:[%s625_s30 + $0x70] sm:$0xff]  ;;  %v158_v3 = vld [vmem:[%s625_s30 + $0x68] sm:$0xff]  ;;  %p493_p1 = scmp.lt.s32.totalorder %s491_s21, %s485_s0 }
  0x1a   : > { %406 = vmatpush3.xpose.msk.msra.mxu0 %vm164_vm1, %v160_v1  ;;  %v157_v4 = vld [vmem:[%s625_s30 + $0x60] sm:$0xff]  ;;  %v156_v5 = vld [vmem:[%s625_s30 + $0x58] sm:$0xff]  ;;  %v155_v6 = vld [vmem:[%s625_s30 + $0x50] sm:$0xff]  ;;  %p488_p13 = pneg %p487_p12 }
  0x1b   : > { %407 = vmatprep.subr.mxu0 %v547_v0  ;;  %v154_v7 = vld [vmem:[%s625_s30 + $0x48] sm:$0xff]  ;;  %v153_v8 = vld [vmem:[%s625_s30 + $0x40] sm:$0xff]  ;;  %v152_v9 = vld [vmem:[%s625_s30 + $0x38] sm:$0xff]  ;;  %p494_p2 = por %p493_p1, %p492_p0 }
  0x1c   : > { %v151_v10 = vld [vmem:[%s625_s30 + $0x30] sm:$0xff]  ;;  %v150_v11 = vld [vmem:[%s625_s30 + $0x28] sm:$0xff]  ;;  %v149_v12 = vld [vmem:[%s625_s30 + $0x20] sm:$0xff] }
  0x1d   : > { %v148_v13 = vld [vmem:[%s625_s30 + $0x18] sm:$0xff]  ;;  %v147_v14 = vld [vmem:[%s625_s30 + $0x10] sm:$0xff]  ;;  %v146_v15 = vld [vmem:[%s625_s30 + $0x8] sm:$0xff]  ;;  %p495_p3 = pnand %p494_p2, %p488_p13 }
  0x1e   : > { %408 = vmatpush3.xpose.msk.msra.mxu0 %vm164_vm1, %v159_v2  ;;  %v145_v16 = vld [vmem:[%s625_s30] sm:$0xff] }
  0x1f   : > { %409 = vmatprep.subr.mxu0 %v547_v0 }
  0x22   : > { %410 = vmatpush3.xpose.msk.msra.mxu0 %vm164_vm1, %v158_v3 }
  0x23   : > { %411 = vmatprep.subr.mxu0 %v547_v0 }
  0x26   : > { %412 = vmatpush3.xpose.msk.msra.mxu0 %vm164_vm1, %v157_v4 }
  0x27   : > { %413 = vmatprep.subr.mxu0 %v547_v0 }
  0x2a   : > { %414 = vmatpush3.xpose.msk.msra.mxu0 %vm164_vm1, %v156_v5 }
  0x2b   : > { %415 = vmatprep.subr.mxu0 %v547_v0 }
  0x2e   : > { %416 = vmatpush3.xpose.msk.msra.mxu0 %vm164_vm1, %v155_v6 }
  0x2f   : > { %417 = vmatprep.subr.mxu0 %v547_v0 }
  0x32   : > { %418 = vmatpush3.xpose.msk.msra.mxu0 %vm164_vm1, %v154_v7 }
  0x33   : > { %419 = vmatprep.subr.mxu0 %v547_v0 }
  0x36   : > { %420 = vmatpush3.xpose.msk.msra.mxu0 %vm164_vm1, %v153_v8 }
  0x37   : > { %421 = vmatprep.subr.mxu0 %v547_v0 }
  0x3a   : > { %422 = vmatpush3.xpose.msk.msra.mxu0 %vm164_vm1, %v152_v9 }
  0x3b   : > { %423 = vmatprep.subr.mxu0 %v547_v0 }
  0x3e   : > { %424 = vmatpush3.xpose.msk.msra.mxu0 %vm164_vm1, %v151_v10 }
  0x3f   : > { %425 = vmatprep.subr.mxu0 %v547_v0 }
  0x42   : > { %426 = vmatpush3.xpose.msk.msra.mxu0 %vm164_vm1, %v150_v11 }
  0x43   : > { %427 = vmatprep.subr.mxu0 %v547_v0 }
  0x46   : > { %428 = vmatpush3.xpose.msk.msra.mxu0 %vm164_vm1, %v149_v12 }
  0x47   : > { %429 = vmatprep.subr.mxu0 %v547_v0 }
  0x4a   : > { %430 = vmatpush3.xpose.msk.msra.mxu0 %vm164_vm1, %v148_v13 }
  0x4b   : > { %431 = vmatprep.subr.mxu0 %v547_v0 }
  0x4e   : > { %432 = vmatpush3.xpose.msk.msra.mxu0 %vm164_vm1, %v147_v14 }
  0x4f   : > { %433 = vmatprep.subr.mxu0 %v547_v0 }
  0x52   : > { %434 = vmatpush3.xpose.msk.msra.mxu0 %vm164_vm1, %v146_v15 }
  0x53   : > { %435 = vmatprep.subr.mxu0 %v547_v0 }
  0x56   : > { %436 = vmatpush3.xpose.msk.msra.mxu0 %vm164_vm1, %v145_v16 }
  0x59   : > { %438 = vmatmul.mubr.msk.f32.vlgmr.msra.gmra.mxu0 %vm164_vm1, %v161_v17 }
 0x119   : > { %v282_v19 = vpop.f32.mrf.mxu0 }
 0x11a   : > { %v283_v20 = vadd.f32 %v282_v19, %v163_v18 }
 0x11b   : > { %v439_v21 = vpop.f32.mrf.mxu0 }
 0x11c   : > { %v384_v22 = vmul.f32 -1.442695, %v283_v20 }
 0x11e   : > { %481 = vpow2.f32 %v384_v22 }
 0x12b   : > { %v482_v23 = vpop.eup %481 }
 0x12c   : > { %v289_v24 = vadd.f32 1.0, %v482_v23 }
 0x12e   : > { %483 = vrcp.f32 %v289_v24 }
 0x13b   : > { %v484_v25 = vpop.eup %483 }
 0x13c   : > { %292 = vst [vmem:[%s138_s8] sm:$0x1] %v484_v25 }
 0x13d   : > { %498 = shalt.err (!%p495_p3)
}
 0x13e   : > { %s499_s25 = scalar_lea.hbm %s668_s12, 16  ;;  %s503_s28 = scalar_lea.hbm %s706_s3, 32 }
 0x13f   : > { %p500_p4 = scmp.ne.s32.totalorder %s668_s12, %s499_s25  ;;  %p504_p9 = scmp.lt.s32.totalorder %s668_s12, %s706_s3 }
 0x140   : > { %p505_p10 = scmp.lt.s32.totalorder %s503_s28, %s499_s25 }
 0x141   : > { %p501_p7 = pnand %p500_p4, %p608_p5 }
 0x142   : > { %p506_p11 = por %p505_p10, %p504_p9 }
 0x143   : > { %p502_p8 = pneg %p501_p7 }
 0x145   : > { %p507_p12 = pnand %p506_p11, %p502_p8 }
 0x147   : > { %510 = shalt.err (!%p507_p12)
}
 0x148   : > { %440 = dma.vmem_to_hbm [thread:$0]  (%p608_p5), %s307_s9, 16, %s668_s12, %s294_s13  }
 0x149 PF: > { %p446_p13 = scmp.ge.s32.totalorder %s545_s17, 2  ;;  %s318_s4 = sand.u32 1, %s533_s14  }
 0x14a   : > { %s319_s5 = scalar_lea.sflag [#allocation5], %s318_s4 }
 0x14b   : > { %p443_p0 = pnand %p446_p13, %p612_p6 }
 0x14d   : > { %p444_p1 = pneg %p443_p0 }
 0x14f   : > { %528 = dma.done.wait (%p444_p1), %s319_s5, 16  }
 0x150   : > { %530 = vsyncadd (%p444_p1), %s319_s5, 4294967280  ;;  %p14_p2 = scmp.ge.s32.totalorder %s596_s19, 4   ;;  %s709_s14 = smov %s537_s15 }
 0x151   : > { %s710_s15 = smov %s541_s16  ;;  %s711_s16 = smov %s606_s22 }
 0x152   : > { %s712_s17 = smov %s596_s19  ;;  %16 = sbr.rel (!%p14_p2) target bundleno = 5 (0x5), region = 63 }
 0x157   :  { %323 = vsyncpa [#allocation5], 1 }
 0x158   :  { %325 = vsyncpa [#allocation5 + $0x1], 1 }

</bundles_post_ra>
